<compile_context>
chip_gen: v5e
topology: v5e:2x2
jax: 0.10.0
libtpu: 0.0.40
codegen_flags: <defaults>
</compile_context>

<pallas_src>
import jax
import jax.numpy as jnp
from jax.experimental import pallas as pl
from jax.experimental.pallas import tpu as pltpu


def _repconv1d_kernel(x_ref, w_ref, b_ref, o_ref):
    """One grid step: Bt samples of a SAME-padded, stride-1, groups=1 Conv1d.

    x_ref : (Bt, C_in,  L + K - 1)  input, pre-padded along L
    w_ref : (K,  C_out, C_in)       merged (reparameterized) taps
    b_ref : (C_out, 1)              merged bias
    o_ref : (Bt, C_out, L)          lane-dense output (L on lanes)
    """
    bt, c_out, L = o_ref.shape
    k_taps = w_ref.shape[0]

    for bb in range(bt):                      # static unroll, Bt is small
        x = x_ref[bb]                         # (C_in, L + K - 1)
        acc = jnp.zeros((c_out, L), jnp.float32)
        for k in range(k_taps):               # static unroll over taps
            # out[co, l] += sum_ci W[k, co, ci] * x[ci, l + k]
            acc = acc + jnp.dot(w_ref[k], x[:, k:k + L],
                                preferred_element_type=jnp.float32)
        acc = acc + b_ref[...]                # (C_out, 1) broadcasts over lanes
        o_ref[bb] = acc.astype(o_ref.dtype)


def _pick_batch_tile(batch, per_sample_bytes, target_bytes=1 << 20):
    """Pack several samples per grid step (per-step overhead ~0.35us) while
    keeping >= 2 grid steps so v7x's two TensorCores can split the work."""
    bt = 1
    while (bt < batch and batch % (2 * bt) == 0
           and bt * per_sample_bytes < target_bytes
           and batch // (2 * bt) >= 2):
        bt *= 2
    return bt


def rep_conv1d_forward(x, mix_w, mix_b, rep_ws, rep_bs):
    """Pallas TPU forward of RepConv1d (non-deploy mode, groups=1, stride=1).

    x      : (B, C_in, L) float32
    mix_w  : (C_out, C_in, K),  mix_b : (C_out,) or None
    rep_ws : list of (C_out, C_in, k) residual weights (odd k <= K)
    rep_bs : list of (C_out,) or None residual biases
    returns: (B, C_out, L)
    """
    # TODO(synk): groups > 1 (grouped Conv1d) is not implemented in this path.
    B, C_in, L = x.shape
    C_out, _, K = mix_w.shape
    pad = (K - 1) // 2

    # --- Reparameterize: fold every residual branch into the K-tap kernel ----
    # (weight-sized ops, done once in plain JAX; identical to switch_to_deploy)
    w = mix_w
    b = mix_b if mix_b is not None else jnp.zeros((C_out,), x.dtype)
    for rw, rb in zip(rep_ws, rep_bs):
        r = (K - rw.shape[-1]) // 2
        w = w + jnp.pad(rw, ((0, 0), (0, 0), (r, r)))
        if rb is not None:
            b = b + rb
    w_taps = jnp.transpose(w, (2, 0, 1))          # (K, C_out, C_in)
    b_col = b.reshape(C_out, 1)

    # --- SAME padding along L (the only extra HBM traffic of this path) ------
    # TODO(synk): fold the halo into the kernel with manual DMA to skip this pass.
    x_pad = jnp.pad(x, ((0, 0), (0, 0), (pad, pad)))
    L_pad = L + 2 * pad

    itemsize = jnp.dtype(x.dtype).itemsize
    per_sample_bytes = (C_in * L_pad + C_out * L) * itemsize
    bt = _pick_batch_tile(B, per_sample_bytes)
    grid = (B // bt,)

    # Explicit VMEM budget: double-buffered blocks + weights + headroom,
    # clamped to the 64 MiB a v7x TensorCore actually has.
    vmem_bytes = 2 * bt * per_sample_bytes + 4 * (w_taps.size + b_col.size) * itemsize
    vmem_limit = int(min(max(vmem_bytes + (8 << 20), 16 << 20), 64 << 20))

    cost = pl.CostEstimate(
        flops=2 * B * C_out * C_in * K * L,
        transcendentals=0,
        bytes_accessed=(x_pad.size + w_taps.size + b_col.size
                        + B * C_out * L) * itemsize,
    )

    return pl.pallas_call(
        _repconv1d_kernel,
        out_shape=jax.ShapeDtypeStruct((B, C_out, L), x.dtype),
        grid_spec=pltpu.PrefetchScalarGridSpec(
            num_scalar_prefetch=0,
            grid=grid,
            in_specs=[
                # Bt whole samples per step; last two block dims equal the full
                # array dims, so the (8,128) rule holds for any C_in / L.
                pl.BlockSpec((bt, C_in, L_pad), lambda i: (i, 0, 0)),
                # Weights / bias: tiny, same block for every grid step.
                pl.BlockSpec((K, C_out, C_in), lambda i: (0, 0, 0)),
                pl.BlockSpec((C_out, 1), lambda i: (0, 0)),
            ],
            out_specs=pl.BlockSpec((bt, C_out, L), lambda i: (i, 0, 0)),
        ),
        compiler_params=pltpu.CompilerParams(
            dimension_semantics=("parallel",),    # batch axis -> megacore (v7x)
            vmem_limit_bytes=vmem_limit,
        ),
        cost_estimate=cost,
    )(x_pad, w_taps, b_col)


# ------------------------------ reference & demo -----------------------------

def _ref_rep_conv1d(x, mix_w, mix_b, rep_ws, rep_bs):
    """Pure-JAX reference computed branch-by-branch, like torch forward()."""
    def conv(x, w, b):
        k = w.shape[-1]
        p = (k - 1) // 2
        y = jax.lax.conv_general_dilated(
            x, w, window_strides=(1,), padding=[(p, p)],
            dimension_numbers=("NCH", "OIH", "NCH"))
        if b is not None:
            y = y + b[None, :, None]
        return y
    out = conv(x, mix_w, mix_b)
    for rw, rb in zip(rep_ws, rep_bs):
        out = out + conv(x, rw, rb)
    return out


if __name__ == "__main__":
    key = jax.random.PRNGKey(0)
    B, C_in, C_out, L = 2, 8, 8, 128
    K, rep_list = 5, (1, 3)

    keys = jax.random.split(key, 3 + 2 * len(rep_list))
    x = jax.random.normal(keys[0], (B, C_in, L), dtype=jnp.float32)

    # Same init scheme as RepConv1d.init_weights (uniform(-k**-0.5, k**-0.5)).
    cmax = K ** -0.5
    mix_w = jax.random.uniform(keys[1], (C_out, C_in, K), jnp.float32, -cmax, cmax)
    mix_b = jax.random.uniform(keys[2], (C_out,), jnp.float32, -cmax, cmax)
    rep_ws, rep_bs = [], []
    for i, k in enumerate(rep_list):
        rmax = max(k, 1) ** -0.5
        rep_ws.append(jax.random.uniform(keys[3 + 2 * i], (C_out, C_in, k),
                                         jnp.float32, -rmax, rmax))
        rep_bs.append(jax.random.uniform(keys[4 + 2 * i], (C_out,),
                                         jnp.float32, -rmax, rmax))

    out = rep_conv1d_forward(x, mix_w, mix_b, rep_ws, rep_bs)
    out = jax.block_until_ready(out)

    ref = _ref_rep_conv1d(x, mix_w, mix_b, rep_ws, rep_bs)
    assert out.shape == ref.shape, (out.shape, ref.shape)
    assert bool(jnp.allclose(out, ref, rtol=1e-4, atol=1e-4)), \
        "mismatch vs reference RepConv1d forward"

    print("KERNEL_OK")
</pallas_src>

<mosaic_0001>
module attributes {stable_mosaic.version = 11 : i64} {
  func.func @_repconv1d_kernel(%arg0: i32, %arg1: memref<1x8x132xf32, #tpu.memory_space<vmem>>, %arg2: memref<5x8x8xf32, #tpu.memory_space<vmem>>, %arg3: memref<8x1xf32, #tpu.memory_space<vmem>>, %arg4: memref<1x8x128xf32, #tpu.memory_space<vmem>>) attributes {dimension_semantics = [#tpu.dimension_semantics<parallel>], iteration_bounds = array<i64: 2>, scalar_prefetch = 0 : i64, scratch_operands = 0 : i64, tpu.core_type = #tpu.core_type<tc>, window_params = [{transform_indices = @transform_0, window_bounds = array<i64: 1, 8, 132>}, {pipeline_mode = #tpu.pipeline_mode<synchronous>, transform_indices = @transform_1, window_bounds = array<i64: 5, 8, 8>}, {pipeline_mode = #tpu.pipeline_mode<synchronous>, transform_indices = @transform_2, window_bounds = array<i64: 8, 1>}, {transform_indices = @transform_3, window_bounds = array<i64: 1, 8, 128>}]} {
    %c0 = arith.constant 0 : index
    %c0_0 = arith.constant 0 : index
    %c0_1 = arith.constant 0 : index
    %0 = vector.load %arg1[%c0, %c0_0, %c0_1] : memref<1x8x132xf32, #tpu.memory_space<vmem>>, vector<1x8x132xf32>
    %1 = vector.shape_cast %0 : vector<1x8x132xf32> to vector<8x132xf32>
    %cst = arith.constant 0.000000e+00 : f32
    %2 = vector.broadcast %cst : f32 to vector<8x128xf32>
    %c0_2 = arith.constant 0 : index
    %c0_3 = arith.constant 0 : index
    %c0_4 = arith.constant 0 : index
    %3 = vector.load %arg2[%c0_2, %c0_3, %c0_4] : memref<5x8x8xf32, #tpu.memory_space<vmem>>, vector<1x8x8xf32>
    %4 = vector.shape_cast %3 : vector<1x8x8xf32> to vector<8x8xf32>
    %5 = vector.extract_strided_slice %1 {offsets = [0, 0], sizes = [8, 128], strides = [1, 1]} : vector<8x132xf32> to vector<8x128xf32>
    %cst_5 = arith.constant dense<0.000000e+00> : vector<8x128xf32>
    %6 = tpu.matmul %4, %5, %cst_5 {dimension_numbers = #tpu.dot_dimension_numbers<[1], [0], [0], [1], [0, 0, 1, 1], [], []>} : vector<8x8xf32>, vector<8x128xf32>, vector<8x128xf32> -> vector<8x128xf32>
    %7 = arith.addf %2, %6 : vector<8x128xf32>
    %c1 = arith.constant 1 : index
    %c0_6 = arith.constant 0 : index
    %c0_7 = arith.constant 0 : index
    %8 = vector.load %arg2[%c1, %c0_6, %c0_7] : memref<5x8x8xf32, #tpu.memory_space<vmem>>, vector<1x8x8xf32>
    %9 = vector.shape_cast %8 : vector<1x8x8xf32> to vector<8x8xf32>
    %10 = vector.extract_strided_slice %1 {offsets = [0, 1], sizes = [8, 128], strides = [1, 1]} : vector<8x132xf32> to vector<8x128xf32>
    %cst_8 = arith.constant dense<0.000000e+00> : vector<8x128xf32>
    %11 = tpu.matmul %9, %10, %cst_8 {dimension_numbers = #tpu.dot_dimension_numbers<[1], [0], [0], [1], [0, 0, 1, 1], [], []>} : vector<8x8xf32>, vector<8x128xf32>, vector<8x128xf32> -> vector<8x128xf32>
    %12 = arith.addf %7, %11 : vector<8x128xf32>
    %c2 = arith.constant 2 : index
    %c0_9 = arith.constant 0 : index
    %c0_10 = arith.constant 0 : index
    %13 = vector.load %arg2[%c2, %c0_9, %c0_10] : memref<5x8x8xf32, #tpu.memory_space<vmem>>, vector<1x8x8xf32>
    %14 = vector.shape_cast %13 : vector<1x8x8xf32> to vector<8x8xf32>
    %15 = vector.extract_strided_slice %1 {offsets = [0, 2], sizes = [8, 128], strides = [1, 1]} : vector<8x132xf32> to vector<8x128xf32>
    %cst_11 = arith.constant dense<0.000000e+00> : vector<8x128xf32>
    %16 = tpu.matmul %14, %15, %cst_11 {dimension_numbers = #tpu.dot_dimension_numbers<[1], [0], [0], [1], [0, 0, 1, 1], [], []>} : vector<8x8xf32>, vector<8x128xf32>, vector<8x128xf32> -> vector<8x128xf32>
    %17 = arith.addf %12, %16 : vector<8x128xf32>
    %c3 = arith.constant 3 : index
    %c0_12 = arith.constant 0 : index
    %c0_13 = arith.constant 0 : index
    %18 = vector.load %arg2[%c3, %c0_12, %c0_13] : memref<5x8x8xf32, #tpu.memory_space<vmem>>, vector<1x8x8xf32>
    %19 = vector.shape_cast %18 : vector<1x8x8xf32> to vector<8x8xf32>
    %20 = vector.extract_strided_slice %1 {offsets = [0, 3], sizes = [8, 128], strides = [1, 1]} : vector<8x132xf32> to vector<8x128xf32>
    %cst_14 = arith.constant dense<0.000000e+00> : vector<8x128xf32>
    %21 = tpu.matmul %19, %20, %cst_14 {dimension_numbers = #tpu.dot_dimension_numbers<[1], [0], [0], [1], [0, 0, 1, 1], [], []>} : vector<8x8xf32>, vector<8x128xf32>, vector<8x128xf32> -> vector<8x128xf32>
    %22 = arith.addf %17, %21 : vector<8x128xf32>
    %c4 = arith.constant 4 : index
    %c0_15 = arith.constant 0 : index
    %c0_16 = arith.constant 0 : index
    %23 = vector.load %arg2[%c4, %c0_15, %c0_16] : memref<5x8x8xf32, #tpu.memory_space<vmem>>, vector<1x8x8xf32>
    %24 = vector.shape_cast %23 : vector<1x8x8xf32> to vector<8x8xf32>
    %25 = vector.extract_strided_slice %1 {offsets = [0, 4], sizes = [8, 128], strides = [1, 1]} : vector<8x132xf32> to vector<8x128xf32>
    %cst_17 = arith.constant dense<0.000000e+00> : vector<8x128xf32>
    %26 = tpu.matmul %24, %25, %cst_17 {dimension_numbers = #tpu.dot_dimension_numbers<[1], [0], [0], [1], [0, 0, 1, 1], [], []>} : vector<8x8xf32>, vector<8x128xf32>, vector<8x128xf32> -> vector<8x128xf32>
    %27 = arith.addf %22, %26 : vector<8x128xf32>
    %c0_18 = arith.constant 0 : index
    %c0_19 = arith.constant 0 : index
    %28 = vector.load %arg3[%c0_18, %c0_19] : memref<8x1xf32, #tpu.memory_space<vmem>>, vector<8x1xf32>
    %29 = vector.broadcast %28 : vector<8x1xf32> to vector<8x128xf32>
    %30 = arith.addf %27, %29 : vector<8x128xf32>
    %c0_20 = arith.constant 0 : index
    %c0_21 = arith.constant 0 : index
    %c0_22 = arith.constant 0 : index
    %31 = vector.load %arg4[%c0_20, %c0_21, %c0_22] : memref<1x8x128xf32, #tpu.memory_space<vmem>>, vector<1x8x128xf32>
    %32 = vector.shape_cast %31 : vector<1x8x128xf32> to vector<8x128xf32>
    %33 = vector.shape_cast %30 : vector<8x128xf32> to vector<1x8x128xf32>
    tpu.vector_store %arg4[%c0_20, %c0_21, %c0_22], %33 {strides = array<i32>} : memref<1x8x128xf32, #tpu.memory_space<vmem>>, vector<1x8x128xf32>,
    return
  }
  func.func @transform_0(%arg0: i32) -> (i32, i32, i32) {
    %c0_i32 = arith.constant 0 : i32
    %c0_i32_0 = arith.constant 0 : i32
    %c0_i32_1 = arith.constant 0 : i32
    return %arg0, %c0_i32, %c0_i32_0 : i32, i32, i32
  }
  func.func @transform_1(%arg0: i32) -> (i32, i32, i32) {
    %c0_i32 = arith.constant 0 : i32
    %c0_i32_0 = arith.constant 0 : i32
    %c0_i32_1 = arith.constant 0 : i32
    %c0_i32_2 = arith.constant 0 : i32
    return %c0_i32, %c0_i32_0, %c0_i32_1 : i32, i32, i32
  }
  func.func @transform_2(%arg0: i32) -> (i32, i32) {
    %c0_i32 = arith.constant 0 : i32
    %c0_i32_0 = arith.constant 0 : i32
    %c0_i32_1 = arith.constant 0 : i32
    return %c0_i32, %c0_i32_0 : i32, i32
  }
  func.func @transform_3(%arg0: i32) -> (i32, i32, i32) {
    %c0_i32 = arith.constant 0 : i32
    %c0_i32_0 = arith.constant 0 : i32
    %c0_i32_1 = arith.constant 0 : i32
    return %arg0, %c0_i32, %c0_i32_0 : i32, i32, i32
  }
}

</mosaic_0001>

<bundles_post_ra>
// kernel: tpu_custom_call.1
= control target key start
LH: loop header
LB: loop body
LE: loop exit
PB: predicated region body
PF: predicated region fallthrough
CT: control target
= control target key end

     0   :  { %8 = vsyncpa [#allocation3], 0  ;;  %s882_s0 = inlined_call_operand.hbm [shape: f32[2,8,132], index: 0, kind: input, shape index: {}]   ;;  %s883_s1 = inlined_call_operand.hbm [shape: f32[5,8,8], index: 1, kind: input, shape index: {}]   ;;  %s884_s2 = inlined_call_operand.vmem [shape: f32[8,1], index: 2, kind: input, shape index: {}]   ;;  %s885_s3 = inlined_call_operand.hbm [shape: f32[2,8,128], index: 3, kind: output, shape index: {}]  }
   0x1   :  { %10 = vsyncpa [#allocation3 + $0x1], 0 }
   0x2   :  { %11 = vsyncpa [#allocation6], 0 }
   0x3   :  { %12 = vsyncpa [#allocation4], 0 }
   0x4   :  { %14 = vsyncpa [#allocation4 + $0x1], 0  ;;  %s737_s12 = smov 0   ;;  %s739_s13 = smov 0  }
   0x5   :  { %s741_s14 = smov 0   ;;  %s743_s15 = smov 0  }
   0x6 LB: > { %s130_s18 = sshll.u32 %s883_s1, 4  ;;  %s761_s19 = sadd.s32 4294967295, %s707_s15   ;;  %s707_s15 = sphi %s743_s15, %s895_s15   ;;  %s703_s14 = sphi %s741_s14, %s894_s14   ;;  %s699_s13 = sphi %s739_s13, %s893_s13   ;;  %s695_s12 = sphi %s737_s12, %s892_s12   ;;  %s131_s18 = int_to_ptr.hbm [resolvable:$true] %s130_s18 }
   0x7   : > { %p471_p0 = scmp.ge.s32.totalorder %s707_s15, 1  ;;  %p41_p1 = scmp.eq.s32.totalorder %s761_s19, 0 }
   0x8   : > { %p119_p2 = scmp.lt.s32.totalorder %s707_s15, 3  ;;  %s709_s21 = smov [#allocation5]  }
   0x9   : > { %s132_s22 = sshll.u32 %s709_s21, 4  ;;  %s710_s23 = smov 128   ;;  %s133_s22 = int_to_ptr.vmem [resolvable:$true] %s132_s22 }
   0xa   : > { %p766_p3 = pnand %p471_p0, %p119_p2  ;;  %s711_s24 = smov 8  }
   0xb   : > { %s470_s25 = sadd.s32 4294967294, %s707_s15   ;;  %s777_s26 = sadd.s32 1, %s707_s15  }
   0xc   : > { %p499_p4 = pneg %p766_p3  ;;  %s27_s27 = sadd.s32 1, %s703_s14 }
   0xd   : > { %s24_s28 = ssub.s32 %s707_s15, %s777_s26  ;;  %p34_p7 = scmp.ne.s32.totalorder %s703_s14, %s699_s13 }
   0xe   : > { %p500_p6 = pnand %p499_p4, %p41_p1  ;;  %p25_p8 = scmp.eq.s32.totalorder %s24_s28, 0 }
   0xf   : > { %p35_p9 = scmp.eq.s32.totalorder %s707_s15, 0  ;;  %p40_p10 = scmp.ne.s32.totalorder %s699_s13, %s695_s12 }
  0x10   : > { %502 = dma.hbm_to_vmem [thread:$0]  (!%p500_p6), %s131_s18, 640, %s133_s22, [#allocation6], %s710_s23, %s710_s23, %s711_s24  }
  0x11   : > { %p106_p11 = scmp.eq.s32.totalorder %s761_s19, 1  ;;  %p793_p12 = por %p41_p1, %p40_p10 }
  0x12   : > { %s789_s29 = scalar_select %p25_p8, %s703_s14, %s27_s27  }
  0x13   : > { %p797_p13 = por %p106_p11, %p34_p7  ;;  %p112_p0 = scmp.eq.s32.totalorder %s470_s25, 1 }
  0x14   : > { %p36_p2 = por %p35_p9, %p34_p7  ;;  %s149_s5 = sand.u32 1, %s703_s14  }
  0x15   : > { %p802_p4 = por %p112_p0, %p40_p10  ;;  %p512_p6 = scmp.lt.s32.totalorder %s707_s15, 2 }
  0x16   : > { %s474_s7 = sshll.u32 %s149_s5, 4  ;;  %s490_s8 = sshll.u32 %s707_s15, 4 }
  0x17   : > { %s158_s11 = scalar_lea.hbm %s882_s0, %s490_s8  ;;  %s153_s17 = scalar_lea.vmem [#allocation2], %s474_s7 }
  0x18   : > { %s160_s16 = sshll.u32 %s158_s11, 4  ;;  %s162_s18 = sshll.u32 %s153_s17, 4  ;;  %s161_s16 = int_to_ptr.hbm [resolvable:$true] %s160_s16  ;;  %s163_s18 = int_to_ptr.vmem [resolvable:$true] %s162_s18 }
  0x19   : > { %p811_p8 = pnand %p512_p6, %p36_p2  ;;  %s150_s22 = scalar_lea.sflag [#allocation3], %s149_s5 }
  0x1a   : > { %s607_s23 = sshra.s32 %s161_s16, 4  ;;  %s614_s28 = scalar_lea.hbm %s882_s0, 32  ;;  %s608_s23 = int_to_ptr.hbm [resolvable:$true] %s607_s23 }
  0x1b   : > { %s609_s24 = scalar_lea.hbm %s608_s23, 16  ;;  %p611_p9 = pneg %p811_p8 }
  0x1c   : > { %p610_p7 = scmp.ne.s32.totalorder %s608_s23, %s609_s24  ;;  %p615_p0 = scmp.lt.s32.totalorder %s608_s23, %s882_s0 }
  0x1d   : > { %p616_p2 = scmp.lt.s32.totalorder %s614_s28, %s609_s24 }
  0x1e   : > { %p612_p10 = pnand %p611_p9, %p610_p7 }
  0x1f   : > { %p617_p6 = por %p616_p2, %p615_p0 }
  0x20   : > { %p613_p11 = pneg %p612_p10 }
  0x22   : > { %p618_p5 = pnand %p617_p6, %p613_p11 }
  0x24   : > { %621 = shalt.err (!%p618_p5)
}
  0x25   : > { %506 = dma.hbm_to_vmem [thread:$0]  (!%p811_p8), %s161_s16, 256, %s163_s18, %s150_s22  }
  0x26   : > { %171 = sbr.rel (%p766_p3) target bundleno = 317 (0x13d), region = 32  ;;  %s828_s5 = sand.u32 (!%p766_p3), 1, %s699_s13  }
  0x27   : > { %s478_s9 = sshll.u32 (!%p766_p3), %s828_s5, 4  ;;  %s174_s10 = scalar_lea.sflag (!%p766_p3), [#allocation3], %s828_s5 }
  0x28   : > { %s177_s11 = scalar_lea.vmem (!%p766_p3), [#allocation2], %s478_s9 }
  0x2b   : > { %682 = dma.done.wait (%p793_p12), %s174_s10, 256  }
  0x2c   : > { %684 = vsyncadd (%p793_p12), %s174_s10, 4294967040 }
  0x2d   : > { %686 = dma.done.wait (%p41_p1), [#allocation6], 640  }
  0x2e   : > { %688 = vsyncadd (%p41_p1), [#allocation6], 4294966656  ;;  %v206_v0 = vld [vmem:[%s177_s11] sm:$0xff]  ;;  %v207_v1 = vld [vmem:[%s177_s11 + $0x8] sm:$0xff]  ;;  %s712_s20 = smov 126   ;;  %s713_s16 = smov 125  }
  0x2f   : > { %v555_v2 = vpack.i.bf16 %v207_v1, %v206_v0  ;;  %262 = vmatpush.msra.mxu1 %v206_v0  ;;  %s714_s17 = smov 127   ;;  %s715_s18 = smov 124   ;;  %vm220_vm0 = vcmask 64512   ;;  %v208_v3 = vld [vmem:[#allocation5] sm:$0xff]  ;;  %v716_v5 = vmov 0   ;;  %vm273_vm1 = vcmask 1031168  }
  0x30   : > { %482 = vmatmul.msk.f32.vlgmr.msra.gmra.mxu1 %vm220_vm0, %v208_v3  ;;  %v366_v4 = vld [vmem:[%s884_s2] sm:$0xff]  ;;  %575 = vset.pattern.permute.xlu2 %v716_v5  ;;  %vm306_vm2 = vcmask 1022976   ;;  %v268_v12 = vld [vmem:[#allocation5 + $0x10] sm:$0xff]  ;;  %v301_v13 = vld [vmem:[#allocation5 + $0x18] sm:$0xff]  ;;  %vm217_vm3 = vcmask 1039360   ;;  %vm339_vm4 = vcmask 1014784  }
  0x31   : > { %556 = vrot.lane.b32.xlu0 %v555_v2, %s712_s20  ;;  %566 = vrot.lane.b32.xlu1 %v555_v2, %s713_s16  ;;  %v210_v22 = vld [vmem:[#allocation5 + $0x8] sm:$0xff]  ;;  %v334_v25 = vld [vmem:[#allocation5 + $0x20] sm:$0xff]  ;;  %s480_s22 = sshll.u32 %s828_s5, 3  ;;  %s487_s23 = sshll.u32 %s761_s19, 3 }
  0x32   : > { %576 = vset.pattern.permute.xlu0 %v716_v5  ;;  %369 = vperm.xlu2 %575, %v366_v4   ;;  %s385_s27 = scalar_lea.hbm %s885_s3, %s487_s23  ;;  %s205_s28 = scalar_lea.vmem [#allocation7], %s480_s22 }
  0x33   : > { %s387_s7 = sshll.u32 %s205_s28, 4  ;;  %s389_s8 = sshll.u32 %s385_s27, 4  ;;  %s388_s7 = int_to_ptr.vmem [resolvable:$true] %s387_s7  ;;  %s390_s8 = int_to_ptr.hbm [resolvable:$true] %s389_s8 }
  0x34   : > { %s375_s9 = scalar_lea.sflag [#allocation4], %s828_s5  ;;  %s651_s19 = sshra.s32 %s390_s8, 4  ;;  %s652_s19 = int_to_ptr.hbm [resolvable:$true] %s651_s19 }
  0x35   : > { %s653_s10 = scalar_lea.hbm %s652_s19, 8  ;;  %s657_s16 = scalar_lea.hbm %s885_s3, 16 }
  0x36   : > { %p654_p1 = scmp.ne.s32.totalorder %s652_s19, %s653_s10  ;;  %p658_p12 = scmp.lt.s32.totalorder %s652_s19, %s885_s3 }
  0x37   : > { %p659_p8 = scmp.lt.s32.totalorder %s657_s16, %s653_s10 }
  0x38   : > { %p655_p3 = pnand %p654_p1, %p797_p13 }
  0x39   : > { %561 = vrot.lane.b32.xlu0 %v555_v2, %s714_s17  ;;  %571 = vrot.lane.b32.xlu1 %v555_v2, %s715_s18  ;;  %p660_p7 = por %p659_p8, %p658_p12 }
  0x3a   : > { %p656_p5 = pneg %p655_p3 }
  0x3c   : > { %p661_p9 = pnand %p660_p7, %p656_p5 }
  0x8c   : > { %v370_v34 = vpop.permute.xlu2 %369 }
  0xa3   : > { %v557_v6 = vpop.permute.xlu0 %556  ;;  %v567_v7 = vpop.permute.xlu1 %566 }
  0xa4   : > { %v559_v8 = vunpack.i.h.bf16 %v557_v6  ;;  %v558_v9 = vunpack.i.l.bf16 %v557_v6  ;;  %v569_v10 = vunpack.i.h.bf16 %v567_v7  ;;  %v568_v11 = vunpack.i.l.bf16 %v567_v7 }
  0xa6   : > { %v274_v14 = vsel %vm273_vm1, %v558_v9, %v559_v8  ;;  %v307_v15 = vsel %vm306_vm2, %v568_v11, %v569_v10 }
  0xa7   : > { %294 = vmatpush.msra.mxu2 %v274_v14  ;;  %327 = vmatpush.msra.mxu3 %v307_v15 }
  0xa8   : > { %483 = vmatmul.msk.f32.vlgmr.msra.gmra.mxu2 %vm220_vm0, %v268_v12  ;;  %484 = vmatmul.msk.f32.vlgmr.msra.gmra.mxu3 %vm220_vm0, %v301_v13 }
  0xab   : > { %v562_v16 = vpop.permute.xlu0 %561  ;;  %v572_v17 = vpop.permute.xlu1 %571 }
  0xac   : > { %v564_v18 = vunpack.i.h.bf16 %v562_v16  ;;  %v563_v19 = vunpack.i.l.bf16 %v562_v16  ;;  %v574_v20 = vunpack.i.h.bf16 %v572_v17  ;;  %v573_v21 = vunpack.i.l.bf16 %v572_v17 }
  0xad   : > { %v264_v26 = vpop.f32.mrf.mxu1 }
  0xae   : > { %v218_v23 = vsel %vm217_vm3, %v563_v19, %v564_v18  ;;  %v340_v24 = vsel %vm339_vm4, %v573_v21, %v574_v20 }
  0xaf   : > { %239 = vmatpush.msra.mxu0 %v218_v23 }
  0xb0   : > { %481 = vmatmul.msk.f32.vlgmr.msra.gmra.mxu0 %vm220_vm0, %v210_v22 }
  0xb1   : > { %360 = vmatpush.msrb.mxu0 %v340_v24 }
  0xb8   : > { %485 = vmatmul.msk.f32.vlgmr.msrb.gmra.mxu0 %vm220_vm0, %v334_v25 }
 0x12b   : > { %v296_v28 = vpop.f32.mrf.mxu2  ;;  %v329_v31 = vpop.f32.mrf.mxu3 }
 0x12d   : > { %v241_v27 = vpop.f32.mrf.mxu0 }
 0x12e   : > { %v265_v29 = vadd.f32 %v264_v26, %v241_v27 }
 0x130   : > { %v299_v30 = vadd.f32 %v296_v28, %v265_v29 }
 0x132   : > { %v332_v32 = vadd.f32 %v329_v31, %v299_v30 }
 0x135   : > { %v362_v33 = vpop.f32.mrf.mxu0 }
 0x136   : > { %v365_v35 = vadd.f32 %v362_v33, %v332_v32 }
 0x138   : > { %v372_v36 = vadd.f32 %v370_v34, %v365_v35 }
 0x13a   : > { %373 = vst [vmem:[%s205_s28] sm:$0xff] %v372_v36 }
 0x13b   : > { %664 = shalt.err (!%p661_p9)
}
 0x13c   : > { %497 = dma.vmem_to_hbm [thread:$0]  (%p797_p13), %s388_s7, 128, %s390_s8, %s375_s9  }
 0x13d PF: > { %s401_s5 = sand.u32 1, %s695_s12   ;;  %p891_p10 = scmp.ge.s32.totalorder %s707_s15, 2 }
 0x13e   : > { %s402_s30 = scalar_lea.sflag [#allocation4], %s401_s5 }
 0x13f   : > { %p508_p11 = pnand %p891_p10, %p802_p4 }
 0x141   : > { %p509_p0 = pneg %p508_p11 }
 0x143   : > { %690 = dma.done.wait (%p509_p0), %s402_s30, 128  }
 0x144   : > { %692 = vsyncadd (%p509_p0), %s402_s30, 4294967168  ;;  %p17_p2 = scmp.ge.s32.totalorder %s777_s26, 4   ;;  %s892_s12 = smov %s699_s13 }
 0x145   : > { %s893_s13 = smov %s703_s14  ;;  %s894_s14 = smov %s789_s29 }
 0x146   : > { %s895_s15 = smov %s777_s26  ;;  %19 = sbr.rel (!%p17_p2) target bundleno = 6 (0x6), region = 85 }
 0x14b   :  { %408 = vsyncpa [#allocation3], 1 }
 0x14c   :  { %410 = vsyncpa [#allocation3 + $0x1], 1 }
 0x14d   :  { %411 = vsyncpa [#allocation6], 1 }
 0x14e   :  { %412 = vsyncpa [#allocation4], 1 }
 0x14f   :  { %414 = vsyncpa [#allocation4 + $0x1], 1 }

</bundles_post_ra>
